<compile_context>
chip_gen: v6e
topology: v6e:2x2x1
jax: 0.10.0
libtpu: 0.0.40
codegen_flags: <defaults>
</compile_context>

<pallas_src>
import functools

import jax
import jax.numpy as jnp
import numpy as np
from jax import lax
from jax.experimental import pallas as pl
from jax.experimental.pallas import tpu as pltpu

EPS = 1e-5  # nn.BatchNorm2d default eps


def _round_up(x, m):
    return ((x + m - 1) // m) * m


# --------------------------------------------------------------------------
# Lane-roll convention probe.  pltpu.roll is documented to match jnp.roll;
# probe it once on the device so the kernel is robust across jax versions.
# --------------------------------------------------------------------------
@functools.lru_cache(maxsize=None)
def _roll_matches_jnp():
    def k(x_ref, o_ref):
        o_ref[...] = pltpu.roll(x_ref[...], shift=1, axis=1)

    x = jnp.arange(8 * 128, dtype=jnp.float32).reshape(8, 128)
    y = pl.pallas_call(k, out_shape=jax.ShapeDtypeStruct((8, 128), jnp.float32))(x)
    return bool(np.asarray(jax.device_get(y))[0, 1] == 0.0)  # jnp.roll: y[0,1]==x[0,0]


# --------------------------------------------------------------------------
# Trace-time constants: boundary masks for the 9 conv taps and 0/1 spatial
# resampling matrices (stride-2 select, ConvTranspose dilate/pad, crop).
# --------------------------------------------------------------------------
def _tap_masks(n, h, w):
    m = n * h * w
    idx = np.arange(m)
    hh = (idx // w) % h
    ww = idx % w
    out = np.zeros((9, 1, m), np.float32)
    for t in range(9):
        dh, dw = divmod(t, 3)
        sh, sw = hh + dh - 1, ww + dw - 1
        out[t, 0] = ((sh >= 0) & (sh < h) & (sw >= 0) & (sw < w)).astype(np.float32)
    return out


def _stride2_select(n, h, w):
    ho, wo = h // 2, w // 2
    s = np.zeros((n * h * w, n * ho * wo), np.float32)
    for b in range(n):
        for i in range(ho):
            for j in range(wo):
                s[b * h * w + 2 * i * w + 2 * j, b * ho * wo + i * wo + j] = 1.0
    return s


def _dilate_scatter(n, hi, wi, hd, wd, md):
    # ConvTranspose(k3, s2, p1, op1) == valid conv on the zero-dilated input
    # placed at rows/cols (1 + 2i) of an (hd, wd) = (2*hi+2, 2*wi+2) grid.
    e = np.zeros((n * hi * wi, md), np.float32)
    for b in range(n):
        for i in range(hi):
            for j in range(wi):
                e[b * hi * wi + i * wi + j,
                  b * hd * wd + (2 * i + 1) * wd + (2 * j + 1)] = 1.0
    return e


def _tconv_select(n, hd, wd, ho, wo, md):
    s = np.zeros((md, n * ho * wo), np.float32)
    for b in range(n):
        for i in range(ho):
            for j in range(wo):
                s[b * hd * wd + i * wd + j, b * ho * wo + i * wo + j] = 1.0
    return s


# --------------------------------------------------------------------------
# Parameter repacking for the kernel.
# --------------------------------------------------------------------------
def _tap_w(w):  # Conv2d weight (Cout, Cin, 3, 3) -> (9, Cout, Cin)
    cout, cin = w.shape[0], w.shape[1]
    return jnp.transpose(w, (2, 3, 0, 1)).reshape(9, cout, cin).astype(jnp.float32)


def _tconv_tap_w(wt):  # ConvTranspose2d weight (Cin, Cout, 3, 3) -> (9, Cout, Cin)
    cin, cout = wt.shape[0], wt.shape[1]
    wf = wt[:, :, ::-1, ::-1]  # equivalent forward conv uses the flipped kernel
    return jnp.transpose(wf, (2, 3, 1, 0)).reshape(9, cout, cin).astype(jnp.float32)


def _gb(gamma, beta):  # -> (2, C, 1): [gamma; beta] as lane-broadcastable columns
    return jnp.stack([gamma, beta]).reshape(2, -1, 1).astype(jnp.float32)


# --------------------------------------------------------------------------
# The fused kernel.
# --------------------------------------------------------------------------
def _unet_kernel(x_ref, w1, w2, w3, w4, w5, w6, w7,
                 gb1, gb2, gb3, gb4, gb5, gb6, gb7,
                 m_hi, m_lo, sdown, edil, stsel, o_ref,
                 *, w_hi, w_lo, w_dil, roll_like_jnp):
    """Whole TestPhaseRecoverUNet forward in one VMEM-resident block."""

    def advance(x, off):
        # y[:, p] = x[:, (p + off) % M]   (lane-axis shift via the XLU)
        m = x.shape[-1]
        k = off % m
        if k == 0:
            return x
        shift = (m - k) if roll_like_jnp else k
        return pltpu.roll(x, shift=shift, axis=1)

    def conv3x3(x, w_ref, mask_ref, grid_w):
        # Stride-1 "same" 3x3 conv on the flattened (n, h, w) lane axis:
        # 9 lane-rolled taps + boundary masks, accumulated in f32.
        acc = None
        for t in range(9):
            dh, dw = divmod(t, 3)
            xs = advance(x, (dh - 1) * grid_w + (dw - 1))
            if not (dh == 1 and dw == 1):
                xs = xs * mask_ref[t]                      # (1, M) boundary mask
            wt = w_ref[t]                                  # (Cout, Cin)
            if wt.shape[1] == 1:                           # Cin == 1: VPU outer product
                contrib = wt * xs
            else:
                contrib = jnp.dot(wt, xs, preferred_element_type=jnp.float32)
            acc = contrib if acc is None else acc + contrib
        return acc

    def bn_act(y, gb_ref, act):
        # Training-mode BatchNorm: centered (two-pass) biased batch variance.
        inv_m = 1.0 / y.shape[1]
        mean = jnp.sum(y, axis=1, keepdims=True) * inv_m
        yc = y - mean
        var = jnp.sum(yc * yc, axis=1, keepdims=True) * inv_m
        z = yc * (gb_ref[0] * lax.rsqrt(var + EPS)) + gb_ref[1]
        return jnp.maximum(z, 0.0) if act == "relu" else jnp.tanh(z)

    # ---- d1.Conv_BN_ReLU_2 --------------------------------------------------
    a = bn_act(conv3x3(x_ref[...], w1, m_hi, w_hi), gb1, "relu")      # (32, M)
    a = bn_act(conv3x3(a, w2, m_hi, w_hi), gb2, "relu")               # (32, M)
    # ---- d1.downSample: stride-2 conv == stride-1 conv + lane selection ------
    y = jnp.dot(conv3x3(a, w3, m_hi, w_hi), sdown[...],
                preferred_element_type=jnp.float32)                   # (32, M/4)
    a = bn_act(y, gb3, "relu")
    # ---- u1.Conv_BN_ReLU_2 ----------------------------------------------------
    a = bn_act(conv3x3(a, w4, m_lo, w_lo), gb4, "relu")               # (64, M/4)
    a = bn_act(conv3x3(a, w5, m_lo, w_lo), gb5, "relu")               # (64, M/4)
    # ---- u1.upSample: ConvTranspose2d(64->32, k3, s2, p1, op1) ----------------
    # dilate/pad scatter (exact 0/1 matmul) -> 9 valid-conv taps on the dilated
    # grid (no masks needed: invalid lanes are dropped by the crop) -> crop.
    xd = jnp.dot(a, edil[...], preferred_element_type=jnp.float32)    # (64, MD)
    yg = None
    for t in range(9):
        kh, kw = divmod(t, 3)
        xs = advance(xd, kh * w_dil + kw)
        c = jnp.dot(w6[t], xs, preferred_element_type=jnp.float32)    # (32, MD)
        yg = c if yg is None else yg + c
    a = bn_act(jnp.dot(yg, stsel[...], preferred_element_type=jnp.float32),
               gb6, "relu")                                           # (32, M)
    # ---- o: Conv2d(32->1) + BatchNorm2d(1) + tanh -----------------------------
    o_ref[...] = bn_act(conv3x3(a, w7, m_hi, w_hi), gb7, "tanh")      # (1, M)


# --------------------------------------------------------------------------
# Wrapper.
# --------------------------------------------------------------------------
def phase_recover_unet(x_nchw, p):
    n, cin, h, w = x_nchw.shape
    assert cin == 1 and h % 2 == 0 and w % 2 == 0
    hl, wl = h // 2, w // 2
    hd, wd = 2 * hl + 2, 2 * wl + 2          # dilated+padded ConvTranspose grid
    m = n * h * w
    ml = n * hl * wl
    md = _round_up(n * hd * wd, 128)         # lane-dense roll extent
    # Toy geometry keeps every lane extent a multiple of 128.
    assert m % 128 == 0 and ml % 128 == 0

    ops = [
        x_nchw.astype(jnp.float32).reshape(1, m),
        _tap_w(p["w1"]), _tap_w(p["w2"]), _tap_w(p["w3"]),
        _tap_w(p["w4"]), _tap_w(p["w5"]), _tconv_tap_w(p["w6"]), _tap_w(p["w7"]),
        _gb(*p["bn1"]), _gb(*p["bn2"]), _gb(*p["bn3"]), _gb(*p["bn4"]),
        _gb(*p["bn5"]), _gb(*p["bn6"]), _gb(*p["bn7"]),
        jnp.asarray(_tap_masks(n, h, w)),                       # (9, 1, M)
        jnp.asarray(_tap_masks(n, hl, wl)),                     # (9, 1, M/4)
        jnp.asarray(_stride2_select(n, h, w)),                  # (M, M/4)
        jnp.asarray(_dilate_scatter(n, hl, wl, hd, wd, md)),    # (M/4, MD)
        jnp.asarray(_tconv_select(n, hd, wd, h, w, md)),        # (MD, M)
    ]
    kern = functools.partial(_unet_kernel, w_hi=w, w_lo=wl, w_dil=wd,
                             roll_like_jnp=_roll_matches_jnp())
    out = pl.pallas_call(
        kern,
        out_shape=jax.ShapeDtypeStruct((1, m), jnp.float32),
        compiler_params=pltpu.CompilerParams(vmem_limit_bytes=32 * 1024 * 1024),
    )(*ops)
    return out.reshape(n, h, w)              # == .squeeze() of (N, 1, H, W)


# --------------------------------------------------------------------------
# Parameters and a pure-JAX reference (used only for the self-check in main).
# --------------------------------------------------------------------------
def _init_params(key):
    ks = iter(jax.random.split(key, 32))

    def conv(cout, cin):
        return 0.1 * jax.random.normal(next(ks), (cout, cin, 3, 3), jnp.float32)

    def bias(c):
        return 0.1 * jax.random.normal(next(ks), (c,), jnp.float32)

    def bn(c):
        g = 1.0 + 0.1 * jax.random.normal(next(ks), (c,), jnp.float32)
        b = 0.1 * jax.random.normal(next(ks), (c,), jnp.float32)
        return g, b

    p = {}
    p["w1"], p["b1"], p["bn1"] = conv(32, 1), bias(32), bn(32)     # d1 conv1
    p["w2"], p["b2"], p["bn2"] = conv(32, 32), bias(32), bn(32)    # d1 conv2
    p["w3"], p["b3"], p["bn3"] = conv(32, 32), bias(32), bn(32)    # d1 downSample
    p["w4"], p["b4"], p["bn4"] = conv(64, 32), bias(64), bn(64)    # u1 conv1
    p["w5"], p["b5"], p["bn5"] = conv(64, 64), bias(64), bn(64)    # u1 conv2
    p["w6"] = 0.1 * jax.random.normal(next(ks), (64, 32, 3, 3), jnp.float32)
    p["b6"], p["bn6"] = bias(32), bn(32)                           # u1 upSample
    p["w7"], p["b7"], p["bn7"] = conv(1, 32), bias(1), bn(1)       # output conv
    return p


def _reference_forward(x, p):
    """f32 NCHW reference (biases included; they cancel under batch-stat BN)."""

    def conv(x, w, b, stride=1):
        y = lax.conv_general_dilated(
            x, w, window_strides=(stride, stride), padding=((1, 1), (1, 1)),
            dimension_numbers=("NCHW", "OIHW", "NCHW"),
            precision=lax.Precision.HIGHEST)
        return y + b.reshape(1, -1, 1, 1)

    def bn(y, g, b):
        mean = jnp.mean(y, axis=(0, 2, 3), keepdims=True)
        var = jnp.mean((y - mean) ** 2, axis=(0, 2, 3), keepdims=True)
        return (y - mean) * lax.rsqrt(var + EPS) * g.reshape(1, -1, 1, 1) \
            + b.reshape(1, -1, 1, 1)

    def tconv(x, w):  # ConvTranspose2d(k=3, s=2, p=1, output_padding=1)
        n, _, hh, ww = x.shape
        cout = w.shape[1]
        out = jnp.zeros((n, cout, 2 * hh, 2 * ww), jnp.float32)
        for kh in range(3):
            for kw in range(3):
                contrib = jnp.einsum("nihw,io->nohw", x, w[:, :, kh, kw],
                                     precision=lax.Precision.HIGHEST)
                hs = 1 if kh == 0 else 0
                ws = 1 if kw == 0 else 0
                th, tw = 2 * hs + (kh - 1), 2 * ws + (kw - 1)
                out = out.at[:, :, th: th + 2 * (hh - hs): 2,
                             tw: tw + 2 * (ww - ws): 2].add(contrib[:, :, hs:, ws:])
        return out

    relu = lambda v: jnp.maximum(v, 0.0)
    h = relu(bn(conv(x, p["w1"], p["b1"]), *p["bn1"]))
    out_deep = relu(bn(conv(h, p["w2"], p["b2"]), *p["bn2"]))
    out_next = relu(bn(conv(out_deep, p["w3"], p["b3"], stride=2), *p["bn3"]))
    u = relu(bn(conv(out_next, p["w4"], p["b4"]), *p["bn4"]))
    u = relu(bn(conv(u, p["w5"], p["b5"]), *p["bn5"]))
    u = relu(bn(tconv(u, p["w6"]) + p["b6"].reshape(1, -1, 1, 1), *p["bn6"]))
    o = jnp.tanh(bn(conv(u, p["w7"], p["b7"]), *p["bn7"]))
    return jnp.squeeze(o)


if __name__ == "__main__":
    key = jax.random.PRNGKey(0)
    kx, kp = jax.random.split(key)
    x = jax.random.normal(kx, (2, 1, 16, 16), jnp.float32)
    params = _init_params(kp)

    _roll_matches_jnp()  # resolve the lane-roll convention once, outside jit

    fwd = jax.jit(lambda xx: phase_recover_unet(xx, params))
    out = jax.block_until_ready(fwd(x))
    assert out.shape == (2, 16, 16), out.shape
    assert bool(jnp.all(jnp.isfinite(out)))

    ref = jax.block_until_ready(jax.jit(lambda xx: _reference_forward(xx, params))(x))
    max_err = float(jnp.max(jnp.abs(out - ref)))
    assert max_err < 0.15, f"kernel/reference mismatch: max abs err = {max_err}"

    print("KERNEL_OK")
</pallas_src>

<mosaic_0001>
module attributes {stable_mosaic.version = 11 : i64} {
  func.func @k(%arg0: memref<8x128xf32, #tpu.memory_space<vmem>>, %arg1: memref<8x128xf32, #tpu.memory_space<vmem>>) attributes {dimension_semantics = [], scalar_prefetch = 0 : i64, scratch_operands = 0 : i64, tpu.core_type = #tpu.core_type<tc>} {
    %c0 = arith.constant 0 : index
    %c0_0 = arith.constant 0 : index
    %0 = vector.load %arg0[%c0, %c0_0] : memref<8x128xf32, #tpu.memory_space<vmem>>, vector<8x128xf32>
    %c1_i32 = arith.constant 1 : i32
    %1 = tpu.dynamic_rotate %0 by %c1_i32 dim 1 : vector<8x128xf32>, i32 -> vector<8x128xf32>
    %c0_1 = arith.constant 0 : index
    %c0_2 = arith.constant 0 : index
    %2 = vector.load %arg1[%c0_1, %c0_2] : memref<8x128xf32, #tpu.memory_space<vmem>>, vector<8x128xf32>
    tpu.vector_store %arg1[%c0_1, %c0_2], %1 {strides = array<i32>} : memref<8x128xf32, #tpu.memory_space<vmem>>, vector<8x128xf32>,
    return
  }
}

</mosaic_0001>

<bundles_post_ra>
// kernel: tpu_custom_call.1
= control target key start
LH: loop header
LB: loop body
LE: loop exit
PB: predicated region body
PF: predicated region fallthrough
CT: control target
= control target key end

     0   :  { %6 = vsyncpa [#allocation3], 0  ;;  %s106_s0 = inlined_call_operand.hbm [shape: f32[8,128], index: 0, kind: input, shape index: {}]   ;;  %s107_s1 = inlined_call_operand.hbm [shape: f32[8,128], index: 1, kind: output, shape index: {}]  }
   0x1   :  { %7 = vsyncpa [#allocation4], 0  ;;  %s87_s6 = smov [#allocation2]  }
   0x2   :  { %s14_s7 = sshll.u32 %s87_s6, 4  ;;  %s15_s7 = int_to_ptr.vmem [resolvable:$true] %s14_s7 }
   0x3   :  { %s51_s8 = scalar_lea.vmem %s15_s7, 128  ;;  %p56_p1 = scmp.lt.s32.totalorder %s15_s7, %s15_s7 }
   0x4   :  { %p52_p0 = scmp.ne.s32.totalorder %s15_s7, %s51_s8  ;;  %p57_p2 = scmp.lt.s32.totalorder %s51_s8, %s51_s8 }
   0x6   :  { %p58_p3 = por %p57_p2, %p56_p1 }
   0x8   :  { %p59_p4 = pnand %p58_p3, %p52_p0 }
   0xa   :  { %62 = shalt.err (!%p59_p4)
}
   0xb   :  { %17 = dma.hbm_to_vmem [thread:$0]  %s106_s0, 128, %s15_s7, [#allocation3]  }
   0xc   :  { %83 = dma.done.wait [#allocation3], 128  }
   0xd   :  { %84 = vsyncadd [#allocation3], 4294967168  ;;  %v21_v0 = vld [vmem:[#allocation2] sm:$0xff]  ;;  %s88_s11 = smov 1   ;;  %s89_s12 = smov [#allocation5]  }
   0xe   :  { %22 = vrot.lane.b32.xlu0 %v21_v0, %s88_s11  ;;  %s31_s13 = sshll.u32 %s89_s12, 4  ;;  %s32_s13 = int_to_ptr.vmem [resolvable:$true] %s31_s13 }
   0xf   :  { %s63_s14 = scalar_lea.vmem %s32_s13, 128  ;;  %p68_p6 = scmp.lt.s32.totalorder %s32_s13, %s32_s13 }
  0x10   :  { %p64_p5 = scmp.ne.s32.totalorder %s32_s13, %s63_s14  ;;  %p69_p7 = scmp.lt.s32.totalorder %s63_s14, %s63_s14 }
  0x12   :  { %p70_p8 = por %p69_p7, %p68_p6 }
  0x14   :  { %p71_p9 = pnand %p70_p8, %p64_p5 }
  0x80   :  { %v23_v1 = vpop.permute.xlu0 %22 }
  0x81   :  { %24 = vst [vmem:[#allocation5] sm:$0xff] %v23_v1 }
  0x82   :  { %74 = shalt.err (!%p71_p9)
}
  0x83   :  { %34 = dma.vmem_to_hbm [thread:$0]  %s32_s13, 128, %s107_s1, [#allocation4]  }
  0x84   :  { %85 = dma.done.wait [#allocation4], 128  }
  0x85   :  { %86 = vsyncadd [#allocation4], 4294967168 }
  0x86   :  { %38 = vsyncpa [#allocation3], 1 }
  0x87   :  { %39 = vsyncpa [#allocation4], 1 }

</bundles_post_ra>
